<compile_context>
chip_gen: v7x
topology: tpu7x:2x2x1
jax: 0.10.0
libtpu: 0.0.40
codegen_flags: <defaults>
</compile_context>

<pallas_src>
import math

import jax
import jax.numpy as jnp
from jax.experimental import pallas as pl
from jax.experimental.pallas import tpu as pltpu  # noqa: F401  (TPU backend)

HIDDEN = 32
NUM_HEADS = 4
HEAD_DIM = HIDDEN // NUM_HEADS
BATCH = 2
SEQ = 8
TOKENS = BATCH * SEQ                      # flattened (batch * seq) token axis
SCALE = 1.0 / math.sqrt(float(HEAD_DIM))


def _self_attention_kernel(xq_ref, xk_ref, xv_ref,
                           wq_ref, bq_ref, wk_ref, bk_ref, wv_ref, bv_ref,
                           wo_ref, bo_ref, hmask_ref, bias_ref, out_ref):
    # xq/xk/xv:   (TOKENS, H)          flattened activations
    # wq/wk/wv:   (H, H)               pre-transposed (in, out); SCALE folded into wq
    # bq/bk/bv:   (1, H)               biases (bq pre-scaled)
    # wo, bo:     (H, H), (1, H)       pre-transposed output projection
    # hmask_ref:  (NUM_HEADS*TOKENS, H)      head lane-mask (row-block n keeps head n lanes)
    # bias_ref:   (NUM_HEADS*TOKENS, TOKENS) cross-batch additive bias (0 / -1e30)
    # out_ref:    (TOKENS, H)

    # Projections: three tiny MXU dots (K=32 fits one MXU pass on every generation).
    q = jnp.dot(xq_ref[...], wq_ref[...], preferred_element_type=jnp.float32) + bq_ref[...]
    k = jnp.dot(xk_ref[...], wk_ref[...], preferred_element_type=jnp.float32) + bk_ref[...]
    v = jnp.dot(xv_ref[...], wv_ref[...], preferred_element_type=jnp.float32) + bv_ref[...]

    # Batch the 4 heads into one scores matmul: tile Q over 4 sublane row-blocks and
    # zero out lanes outside each block's head.  Row block n then contracts only
    # against head n's lanes of K.
    head_mask = hmask_ref[...]                                   # (64, 32)
    q_bd = jnp.concatenate([q, q, q, q], axis=0) * head_mask     # (64, 32)

    # scores_bd[n*T + i, j] = <q_head_n[i], k_head_n[j]>  (scale already folded in),
    # plus the cross-batch mask (batch folded into the token axis).
    s = jax.lax.dot_general(
        q_bd, k,
        dimension_numbers=(((1,), (1,)), ((), ())),
        preferred_element_type=jnp.float32) + bias_ref[...]      # (64, 16)

    # TODO(synk): the module's optional user attention mask (masked_fill branch)
    # is not implemented; only the mask=None path is supported.

    # One softmax for all heads / batches.
    m = jnp.max(s, axis=-1, keepdims=True)
    e = jnp.exp(s - m)
    denom = jnp.sum(e, axis=-1, keepdims=True)
    attn = e * pl.reciprocal(denom, approx=True)                 # (64, 16)

    # One AV matmul for all heads, then pull each head's lanes out of its row block
    # with the same lane-mask and fold the 4 blocks together (pure VPU, no concat).
    out_bd = jnp.dot(attn, v, preferred_element_type=jnp.float32) * head_mask  # (64, 32)
    merged = out_bd[0:TOKENS]
    for n in range(1, NUM_HEADS):
        merged = merged + out_bd[n * TOKENS:(n + 1) * TOKENS]    # (16, 32)

    out = jnp.dot(merged, wo_ref[...], preferred_element_type=jnp.float32) + bo_ref[...]
    out_ref[...] = out.astype(out_ref.dtype)


def prepare_params(params):
    """One-time conversion of nn.Linear-style params into kernel-ready constants.

    Runs once at init time (hoisted out of the per-forward path).
    """
    wq, bq, wk, bk, wv, bv, wo, bo = params

    # PyTorch nn.Linear stores (out, in); the kernel wants (in, out).
    # Fold the 1/sqrt(head_dim) attention scale into the Q projection.
    wq_t = (wq.T * SCALE).astype(jnp.float32)
    bq2 = (bq * SCALE).reshape(1, HIDDEN).astype(jnp.float32)
    wk_t = wk.T.astype(jnp.float32)
    bk2 = bk.reshape(1, HIDDEN).astype(jnp.float32)
    wv_t = wv.T.astype(jnp.float32)
    bv2 = bv.reshape(1, HIDDEN).astype(jnp.float32)
    wo_t = wo.T.astype(jnp.float32)
    bo2 = bo.reshape(1, HIDDEN).astype(jnp.float32)

    # Head lane-mask for the batched-heads trick: for row block n (rows
    # [n*TOKENS, (n+1)*TOKENS)), keep only lanes [n*HEAD_DIM, (n+1)*HEAD_DIM).
    r = jnp.arange(NUM_HEADS * TOKENS)[:, None]
    c = jnp.arange(HIDDEN)[None, :]
    head_mask = (c // HEAD_DIM == r // TOKENS).astype(jnp.float32)      # (64, 32)

    # Cross-batch additive bias (batch folded into the token axis), tiled over the
    # 4 head row-blocks: 0 within a batch, -1e30 across batches.
    cj = jnp.arange(TOKENS)[None, :]
    same_batch = ((r % TOKENS) // SEQ) == (cj // SEQ)
    bias_bd = jnp.where(same_batch, 0.0, -1e30).astype(jnp.float32)     # (64, 16)

    return (wq_t, bq2, wk_t, bk2, wv_t, bv2, wo_t, bo2, head_mask, bias_bd)


@jax.jit
def self_attention(query, key, value, prepared):
    """query/key/value: (B, S, H) float32. `prepared` from prepare_params(). Returns (B, S, H)."""
    B, S, H = query.shape
    assert H == HIDDEN and B == BATCH and S == SEQ

    out_flat = pl.pallas_call(
        _self_attention_kernel,
        out_shape=jax.ShapeDtypeStruct((B * S, H), query.dtype),
    )(query.reshape(B * S, H), key.reshape(B * S, H), value.reshape(B * S, H), *prepared)

    return out_flat.reshape(B, S, H)


def _init_params(key):
    """Deterministic init mimicking nn.Linear shapes: W (out,in), b (out,)."""
    ks = jax.random.split(key, 8)
    bound = 1.0 / math.sqrt(HIDDEN)

    def lin(kw, kb):
        w = jax.random.uniform(kw, (HIDDEN, HIDDEN), jnp.float32, -bound, bound)
        b = jax.random.uniform(kb, (HIDDEN,), jnp.float32, -bound, bound)
        return w, b

    wq, bq = lin(ks[0], ks[1])
    wk, bk = lin(ks[2], ks[3])
    wv, bv = lin(ks[4], ks[5])
    wo, bo = lin(ks[6], ks[7])
    return (wq, bq, wk, bk, wv, bv, wo, bo)


def _reference(query, key, value, params):
    """Plain-JAX reference matching the PyTorch forward exactly."""
    wq, bq, wk, bk, wv, bv, wo, bo = params
    B, S, H = query.shape
    Q = query @ wq.T + bq
    K = key @ wk.T + bk
    V = value @ wv.T + bv
    Q = Q.reshape(B, S, NUM_HEADS, HEAD_DIM).transpose(0, 2, 1, 3)
    K = K.reshape(B, S, NUM_HEADS, HEAD_DIM).transpose(0, 2, 1, 3)
    V = V.reshape(B, S, NUM_HEADS, HEAD_DIM).transpose(0, 2, 1, 3)
    energy = jnp.matmul(Q, K.transpose(0, 1, 3, 2)) / jnp.sqrt(jnp.float32(HEAD_DIM))
    attn = jax.nn.softmax(energy, axis=-1)
    x = jnp.matmul(attn, V)
    x = x.transpose(0, 2, 1, 3).reshape(B, S, H)
    return x @ wo.T + bo


if __name__ == "__main__":
    root = jax.random.PRNGKey(0)
    k_in, k_par = jax.random.split(root)
    kq, kk, kv = jax.random.split(k_in, 3)

    query = jax.random.normal(kq, (BATCH, SEQ, HIDDEN), jnp.float32)
    key = jax.random.normal(kk, (BATCH, SEQ, HIDDEN), jnp.float32)
    value = jax.random.normal(kv, (BATCH, SEQ, HIDDEN), jnp.float32)

    params = _init_params(k_par)
    prepared = prepare_params(params)        # weight prep hoisted: runs once

    out = self_attention(query, key, value, prepared)
    out = jax.block_until_ready(out)

    ref = _reference(query, key, value, params)
    assert out.shape == (BATCH, SEQ, HIDDEN)
    # Slightly relaxed tolerance: softmax denominator uses the EUP approximate
    # reciprocal (pl.reciprocal(approx=True)); all matmuls stay in f32.
    assert jnp.allclose(out, ref, atol=2e-3, rtol=2e-3), "mismatch vs reference"

    print("KERNEL_OK")
</pallas_src>

<mosaic_0001>
module attributes {stable_mosaic.version = 11 : i64} {
  func.func @_self_attention_kernel(%arg0: memref<16x32xf32, #tpu.memory_space<vmem>>, %arg1: memref<16x32xf32, #tpu.memory_space<vmem>>, %arg2: memref<16x32xf32, #tpu.memory_space<vmem>>, %arg3: memref<32x32xf32, #tpu.memory_space<vmem>>, %arg4: memref<1x32xf32, #tpu.memory_space<vmem>>, %arg5: memref<32x32xf32, #tpu.memory_space<vmem>>, %arg6: memref<1x32xf32, #tpu.memory_space<vmem>>, %arg7: memref<32x32xf32, #tpu.memory_space<vmem>>, %arg8: memref<1x32xf32, #tpu.memory_space<vmem>>, %arg9: memref<32x32xf32, #tpu.memory_space<vmem>>, %arg10: memref<1x32xf32, #tpu.memory_space<vmem>>, %arg11: memref<64x32xf32, #tpu.memory_space<vmem>>, %arg12: memref<64x16xf32, #tpu.memory_space<vmem>>, %arg13: memref<16x32xf32, #tpu.memory_space<vmem>>) attributes {dimension_semantics = [], scalar_prefetch = 0 : i64, scratch_operands = 0 : i64, tpu.core_type = #tpu.core_type<tc>} {
    %c0 = arith.constant 0 : index
    %c0_0 = arith.constant 0 : index
    %0 = vector.load %arg0[%c0, %c0_0] : memref<16x32xf32, #tpu.memory_space<vmem>>, vector<16x32xf32>
    %c0_1 = arith.constant 0 : index
    %c0_2 = arith.constant 0 : index
    %1 = vector.load %arg3[%c0_1, %c0_2] : memref<32x32xf32, #tpu.memory_space<vmem>>, vector<32x32xf32>
    %cst = arith.constant dense<0.000000e+00> : vector<16x32xf32>
    %2 = tpu.matmul %0, %1, %cst {dimension_numbers = #tpu.dot_dimension_numbers<[1], [0], [0], [1], [0, 0, 1, 1], [], []>} : vector<16x32xf32>, vector<32x32xf32>, vector<16x32xf32> -> vector<16x32xf32>
    %c0_3 = arith.constant 0 : index
    %c0_4 = arith.constant 0 : index
    %3 = vector.load %arg4[%c0_3, %c0_4] : memref<1x32xf32, #tpu.memory_space<vmem>>, vector<1x32xf32>
    %4 = vector.broadcast %3 : vector<1x32xf32> to vector<16x32xf32>
    %5 = arith.addf %2, %4 : vector<16x32xf32>
    %c0_5 = arith.constant 0 : index
    %c0_6 = arith.constant 0 : index
    %6 = vector.load %arg1[%c0_5, %c0_6] : memref<16x32xf32, #tpu.memory_space<vmem>>, vector<16x32xf32>
    %c0_7 = arith.constant 0 : index
    %c0_8 = arith.constant 0 : index
    %7 = vector.load %arg5[%c0_7, %c0_8] : memref<32x32xf32, #tpu.memory_space<vmem>>, vector<32x32xf32>
    %cst_9 = arith.constant dense<0.000000e+00> : vector<16x32xf32>
    %8 = tpu.matmul %6, %7, %cst_9 {dimension_numbers = #tpu.dot_dimension_numbers<[1], [0], [0], [1], [0, 0, 1, 1], [], []>} : vector<16x32xf32>, vector<32x32xf32>, vector<16x32xf32> -> vector<16x32xf32>
    %c0_10 = arith.constant 0 : index
    %c0_11 = arith.constant 0 : index
    %9 = vector.load %arg6[%c0_10, %c0_11] : memref<1x32xf32, #tpu.memory_space<vmem>>, vector<1x32xf32>
    %10 = vector.broadcast %9 : vector<1x32xf32> to vector<16x32xf32>
    %11 = arith.addf %8, %10 : vector<16x32xf32>
    %c0_12 = arith.constant 0 : index
    %c0_13 = arith.constant 0 : index
    %12 = vector.load %arg2[%c0_12, %c0_13] : memref<16x32xf32, #tpu.memory_space<vmem>>, vector<16x32xf32>
    %c0_14 = arith.constant 0 : index
    %c0_15 = arith.constant 0 : index
    %13 = vector.load %arg7[%c0_14, %c0_15] : memref<32x32xf32, #tpu.memory_space<vmem>>, vector<32x32xf32>
    %cst_16 = arith.constant dense<0.000000e+00> : vector<16x32xf32>
    %14 = tpu.matmul %12, %13, %cst_16 {dimension_numbers = #tpu.dot_dimension_numbers<[1], [0], [0], [1], [0, 0, 1, 1], [], []>} : vector<16x32xf32>, vector<32x32xf32>, vector<16x32xf32> -> vector<16x32xf32>
    %c0_17 = arith.constant 0 : index
    %c0_18 = arith.constant 0 : index
    %15 = vector.load %arg8[%c0_17, %c0_18] : memref<1x32xf32, #tpu.memory_space<vmem>>, vector<1x32xf32>
    %16 = vector.broadcast %15 : vector<1x32xf32> to vector<16x32xf32>
    %17 = arith.addf %14, %16 : vector<16x32xf32>
    %c0_19 = arith.constant 0 : index
    %c0_20 = arith.constant 0 : index
    %18 = vector.load %arg11[%c0_19, %c0_20] : memref<64x32xf32, #tpu.memory_space<vmem>>, vector<64x32xf32>
    %19 = tpu.concatenate %5, %5, %5, %5 in 0 : vector<16x32xf32>, vector<16x32xf32>, vector<16x32xf32>, vector<16x32xf32> -> vector<64x32xf32>
    %20 = arith.mulf %19, %18 : vector<64x32xf32>
    %cst_21 = arith.constant dense<0.000000e+00> : vector<64x16xf32>
    %21 = tpu.matmul %20, %11, %cst_21 {dimension_numbers = #tpu.dot_dimension_numbers<[1], [1], [0], [0], [0, 0, 1, 0], [], []>} : vector<64x32xf32>, vector<16x32xf32>, vector<64x16xf32> -> vector<64x16xf32>
    %c0_22 = arith.constant 0 : index
    %c0_23 = arith.constant 0 : index
    %22 = vector.load %arg12[%c0_22, %c0_23] : memref<64x16xf32, #tpu.memory_space<vmem>>, vector<64x16xf32>
    %23 = arith.addf %21, %22 : vector<64x16xf32>
    %cst_24 = arith.constant dense<0xFF800000> : vector<64xf32>
    %24 = vector.multi_reduction <maximumf>, %23, %cst_24 [1] : vector<64x16xf32> to vector<64xf32>
    %25 = vector.shape_cast %24 : vector<64xf32> to vector<64x1xf32>
    %26 = vector.broadcast %25 : vector<64x1xf32> to vector<64x16xf32>
    %27 = arith.subf %23, %26 : vector<64x16xf32>
    %28 = math.exp %27 : vector<64x16xf32>
    %cst_25 = arith.constant dense<0.000000e+00> : vector<64xf32>
    %29 = vector.multi_reduction <add>, %28, %cst_25 [1] : vector<64x16xf32> to vector<64xf32>
    %30 = vector.shape_cast %29 : vector<64xf32> to vector<64x1xf32>
    %31 = tpu.reciprocal %30 {approx = true} : vector<64x1xf32> -> vector<64x1xf32>
    %32 = vector.broadcast %31 : vector<64x1xf32> to vector<64x16xf32>
    %33 = arith.mulf %28, %32 : vector<64x16xf32>
    %cst_26 = arith.constant dense<0.000000e+00> : vector<64x32xf32>
    %34 = tpu.matmul %33, %17, %cst_26 {dimension_numbers = #tpu.dot_dimension_numbers<[1], [0], [0], [1], [0, 0, 1, 1], [], []>} : vector<64x16xf32>, vector<16x32xf32>, vector<64x32xf32> -> vector<64x32xf32>
    %35 = arith.mulf %34, %18 : vector<64x32xf32>
    %36 = vector.extract_strided_slice %35 {offsets = [0, 0], sizes = [16, 32], strides = [1, 1]} : vector<64x32xf32> to vector<16x32xf32>
    %37 = vector.extract_strided_slice %35 {offsets = [16, 0], sizes = [16, 32], strides = [1, 1]} : vector<64x32xf32> to vector<16x32xf32>
    %38 = arith.addf %36, %37 : vector<16x32xf32>
    %39 = vector.extract_strided_slice %35 {offsets = [32, 0], sizes = [16, 32], strides = [1, 1]} : vector<64x32xf32> to vector<16x32xf32>
    %40 = arith.addf %38, %39 : vector<16x32xf32>
    %41 = vector.extract_strided_slice %35 {offsets = [48, 0], sizes = [16, 32], strides = [1, 1]} : vector<64x32xf32> to vector<16x32xf32>
    %42 = arith.addf %40, %41 : vector<16x32xf32>
    %c0_27 = arith.constant 0 : index
    %c0_28 = arith.constant 0 : index
    %43 = vector.load %arg9[%c0_27, %c0_28] : memref<32x32xf32, #tpu.memory_space<vmem>>, vector<32x32xf32>
    %cst_29 = arith.constant dense<0.000000e+00> : vector<16x32xf32>
    %44 = tpu.matmul %42, %43, %cst_29 {dimension_numbers = #tpu.dot_dimension_numbers<[1], [0], [0], [1], [0, 0, 1, 1], [], []>} : vector<16x32xf32>, vector<32x32xf32>, vector<16x32xf32> -> vector<16x32xf32>
    %c0_30 = arith.constant 0 : index
    %c0_31 = arith.constant 0 : index
    %45 = vector.load %arg10[%c0_30, %c0_31] : memref<1x32xf32, #tpu.memory_space<vmem>>, vector<1x32xf32>
    %46 = vector.broadcast %45 : vector<1x32xf32> to vector<16x32xf32>
    %47 = arith.addf %44, %46 : vector<16x32xf32>
    %c0_32 = arith.constant 0 : index
    %c0_33 = arith.constant 0 : index
    %48 = vector.load %arg13[%c0_32, %c0_33] : memref<16x32xf32, #tpu.memory_space<vmem>>, vector<16x32xf32>
    tpu.vector_store %arg13[%c0_32, %c0_33], %47 {strides = array<i32>} : memref<16x32xf32, #tpu.memory_space<vmem>>, vector<16x32xf32>,
    return
  }
}

</mosaic_0001>

<bundles_post_ra>
// kernel: self_attention.1
= control target key start
LH: loop header
LB: loop body
LE: loop exit
PB: predicated region body
PF: predicated region fallthrough
CT: control target
= control target key end

     0   :  { %vm58_vm0 = vcmask 261120   ;;  %s1367_s0 = inlined_call_operand.vmem [shape: f32[16,32], index: 0, kind: input, shape index: {}]   ;;  %s1368_s1 = inlined_call_operand.vmem [shape: f32[16,32], index: 1, kind: input, shape index: {}]   ;;  %s1369_s2 = inlined_call_operand.vmem [shape: f32[16,32], index: 2, kind: input, shape index: {}]   ;;  %s1370_s3 = inlined_call_operand.vmem [shape: f32[32,32], index: 3, kind: input, shape index: {}]   ;;  %s1371_s4 = inlined_call_operand.vmem [shape: f32[1,32], index: 4, kind: input, shape index: {}]   ;;  %s1372_s5 = inlined_call_operand.vmem [shape: f32[32,32], index: 5, kind: input, shape index: {}]   ;;  %s1373_s6 = inlined_call_operand.vmem [shape: f32[1,32], index: 6, kind: input, shape index: {}]   ;;  %s1374_s7 = inlined_call_operand.vmem [shape: f32[32,32], index: 7, kind: input, shape index: {}]   ;;  %s1375_s8 = inlined_call_operand.vmem [shape: f32[1,32], index: 8, kind: input, shape index: {}]   ;;  %s1376_s9 = inlined_call_operand.vmem [shape: f32[32,32], index: 9, kind: input, shape index: {}]   ;;  %s1377_s10 = inlined_call_operand.vmem [shape: f32[1,32], index: 10, kind: input, shape index: {}]   ;;  %s1378_s11 = inlined_call_operand.vmem [shape: f32[64,32], index: 11, kind: input, shape index: {}]   ;;  %s1379_s12 = inlined_call_operand.vmem [shape: f32[64,16], index: 12, kind: input, shape index: {}]   ;;  %s1380_s13 = inlined_call_operand.hbm [shape: f32[16,32], index: 13, kind: output, shape index: {}]  }
   0x1   :  { %v142_v0 = vld [vmem:[%s1372_s5] sm:$0xff]  ;;  %v143_v1 = vld [vmem:[%s1372_s5 + $0x8] sm:$0xff]  ;;  %v144_v2 = vld [vmem:[%s1372_s5 + $0x10] sm:$0xff] }
   0x2   :  { %v987_v3 = vpack.c.bf16 %v143_v1, %v142_v0  ;;  %v145_v4 = vld [vmem:[%s1372_s5 + $0x18] sm:$0xff]  ;;  %v47_v5 = vld [vmem:[%s1370_s3] sm:$0xff]  ;;  %v48_v6 = vld [vmem:[%s1370_s3 + $0x8] sm:$0xff] }
   0x3   :  { %v991_v7 = vpack.c.bf16 %v145_v4, %v144_v2  ;;  %v979_v8 = vpack.c.bf16 %v48_v6, %v47_v5  ;;  %v140_v9 = vld [vmem:[%s1368_s1] sm:$0xff]  ;;  %v49_v10 = vld [vmem:[%s1370_s3 + $0x10] sm:$0xff]  ;;  %v50_v11 = vld [vmem:[%s1370_s3 + $0x18] sm:$0xff] }
   0x4   :  { %988 = vmatprep.subr.bf16.mxu1 %v987_v3  ;;  %922 = vmatprep.mubr.msk.f32.mxu1 %vm58_vm0, %v140_v9  ;;  %v45_v12 = vld [vmem:[%s1367_s0] sm:$0xff]  ;;  %v983_v13 = vpack.c.bf16 %v50_v11, %v49_v10 }
   0x5   :  { %990 = vmatpush3.bf16.msra.mxu1 %v987_v3  ;;  %980 = vmatprep.subr.bf16.mxu0 %v979_v8 }
   0x6   :  { %18 = vsyncpa [#allocation3], 0  ;;  %992 = vmatprep.subr.bf16.mxu1 %v991_v7  ;;  %982 = vmatpush3.bf16.msra.mxu0 %v979_v8  ;;  %v141_v14 = vld [vmem:[%s1368_s1 + $0x8] sm:$0xff]  ;;  %v832_v16 = vld [vmem:[%s1373_s6] ss:$0 sm:$0xff]  ;;  %vm487_vm2 = vcmask 130048  }
   0x7   :  { %984 = vmatprep.subr.bf16.mxu0 %v983_v13  ;;  %911 = vmatprep.mubr.msk.f32.mxu0 %vm58_vm0, %v45_v12  ;;  %v46_v15 = vld [vmem:[%s1367_s0 + $0x8] sm:$0xff]  ;;  %v829_v18 = vld [vmem:[%s1371_s4] ss:$0 sm:$0xff]  ;;  %vm1004_vm1 = vmpackc.low %vm58_vm0, %vm58_vm0  ;;  %s1080_s6 = smov [#allocation2]  }
   0x8   :  { %v1202_v24 = vld [vmem:[%s1378_s11] sm:$0xff]  ;;  %v1211_v29 = vld [vmem:[%s1378_s11 + $0x8] sm:$0xff]  ;;  %v1216_v30 = vld [vmem:[%s1378_s11 + $0x10] sm:$0xff]  ;;  %s818_s17 = sshll.u32 %s1080_s6, 4  ;;  %s819_s17 = int_to_ptr.vmem [resolvable:$true] %s818_s17 }
   0x9   :  { %994 = vmatpush3.bf16.msra.mxu1 %v991_v7  ;;  %v1223_v33 = vld [vmem:[%s1378_s11 + $0x18] sm:$0xff]  ;;  %v1229_v34 = vld [vmem:[%s1378_s11 + $0x20] sm:$0xff]  ;;  %v1237_v37 = vld [vmem:[%s1378_s11 + $0x28] sm:$0xff]  ;;  %s1056_s18 = scalar_lea.vmem %s819_s17, 256  ;;  %p1061_p1 = scmp.lt.s32.totalorder %s819_s17, %s819_s17 }
   0xa   :  { %986 = vmatpush3.bf16.msra.mxu0 %v983_v13  ;;  %v1243_v38 = vld [vmem:[%s1378_s11 + $0x30] sm:$0xff]  ;;  %v1251_v41 = vld [vmem:[%s1378_s11 + $0x38] sm:$0xff]  ;;  %v236_v43 = vld [vmem:[%s1374_s7] sm:$0xff]  ;;  %p1057_p0 = scmp.ne.s32.totalorder %s819_s17, %s1056_s18  ;;  %p1062_p2 = scmp.lt.s32.totalorder %s1056_s18, %s1056_s18 }
   0xb   :  { %v237_v44 = vld [vmem:[%s1374_s7 + $0x8] sm:$0xff]  ;;  %v238_v45 = vld [vmem:[%s1374_s7 + $0x10] sm:$0xff]  ;;  %v239_v47 = vld [vmem:[%s1374_s7 + $0x18] sm:$0xff] }
   0xc   :  { %923 = vmatmul.mubr.msk.f32.vlgmr.msra.gmra.mrb[0].mxu1 %vm58_vm0, %v141_v14  ;;  %v995_v46 = vpack.c.bf16 %v237_v44, %v236_v43  ;;  %v234_v48 = vld [vmem:[%s1369_s2] sm:$0xff]  ;;  %v999_v49 = vpack.c.bf16 %v239_v47, %v238_v45  ;;  %v235_v50 = vld [vmem:[%s1369_s2 + $0x8] sm:$0xff]  ;;  %v346_v56 = vld [vmem:[%s1379_s12 + $0x10] sm:$0xff]  ;;  %p1063_p3 = por %p1062_p2, %p1061_p1 }
   0xd   :  { %912 = vmatmul.mubr.msk.f32.vlgmr.msra.gmra.mrb[0].mxu0 %vm58_vm0, %v46_v15  ;;  %v344_v51 = vld [vmem:[%s1379_s12] sm:$0xff]  ;;  %v345_v53 = vld [vmem:[%s1379_s12 + $0x8] sm:$0xff]  ;;  %v347_v60 = vld [vmem:[%s1379_s12 + $0x18] sm:$0xff] }
   0xe   :  { %933 = vmatprep.mubr.msk.f32.mxu0 %vm58_vm0, %v234_v48  ;;  %996 = vmatprep.subr.bf16.mxu0 %v995_v46  ;;  %v348_v63 = vld [vmem:[%s1379_s12 + $0x20] sm:$0xff]  ;;  %v349_v4 = vld [vmem:[%s1379_s12 + $0x28] sm:$0xff]  ;;  %v350_v7 = vld [vmem:[%s1379_s12 + $0x30] sm:$0xff]  ;;  %p1064_p4 = pnand %p1063_p3, %p1057_p0 }
   0xf   :  { %998 = vmatpush3.bf16.msra.mxu0 %v995_v46  ;;  %v351_v12 = vld [vmem:[%s1379_s12 + $0x38] sm:$0xff] }
  0x10   :  { %1000 = vmatprep.subr.bf16.mxu0 %v999_v49 }
  0x13   :  { %1002 = vmatpush3.bf16.msra.mxu0 %v999_v49 }
  0x16   :  { %934 = vmatmul.mubr.msk.f32.vlgmr.msra.gmra.mrb[2].mxu0 %vm58_vm0, %v235_v50 }
  0xdf   :  { %v924_v17 = vpop.f32.mrb[0].mxu1 }
  0xe0   :  { %v231_v19 = vadd.f32 %v924_v17, %v832_v16  ;;  %v225_v20 = vpop.f32.mrb[1].mxu1  ;;  %v913_v21 = vpop.f32.mrb[0].mxu0 }
  0xe1   :  { %v226_v22 = vadd.f32 %v832_v16, %v225_v20  ;;  %v131_v23 = vpop.f32.mrb[1].mxu0  ;;  %v137_v28 = vadd.f32 %v913_v21, %v829_v18 }
  0xe2   :  { %v132_v25 = vadd.f32 %v829_v18, %v131_v23 }
  0xe3   :  { %v1003_v26 = vpack.c.bf16 %v231_v19, %v226_v22  ;;  %v337_v31 = vmul.f32 %v1211_v29, %v137_v28  ;;  %v339_v35 = vmul.f32 %v1223_v33, %v137_v28  ;;  %v341_v39 = vmul.f32 %v1237_v37, %v137_v28 }
  0xe4   :  { %v336_v27 = vmul.f32 %v1202_v24, %v132_v25  ;;  %v338_v32 = vmul.f32 %v1216_v30, %v132_v25  ;;  %v340_v36 = vmul.f32 %v1229_v34, %v132_v25  ;;  %v342_v40 = vmul.f32 %v1243_v38, %v132_v25 }
  0xe5   :  { %1005 = vmatprep.subr.msk.bf16.mxu1 %vm1004_vm1, %v1003_v26  ;;  %v343_v42 = vmul.f32 %v1251_v41, %v137_v28 }
  0xe6   :  { %1008 = vmatpush3.bf16.xpose.msk.msra.mxu1 %vm1004_vm1, %v1003_v26  ;;  %940 = vmatprep.mubr.msk.f32.mxu1 %vm58_vm0, %v336_v27 }
  0xed   :  { %941 = vmatmul.mubr.msk.f32.vlgmr.msra.gmra.mrb[2].mxu1 %vm58_vm0, %v337_v31 }
  0xee   :  { %943 = vmatprep.mubr.msk.f32.mxu1 %vm58_vm0, %v338_v32 }
  0xf1   :  { %944 = vmatmul.mubr.msk.f32.gmra.mrb[4].mxu1 %vm58_vm0, %v339_v35 }
  0xf2   :  { %946 = vmatprep.mubr.msk.f32.mxu1 %vm58_vm0, %v340_v36 }
  0xf5   :  { %947 = vmatmul.mubr.msk.f32.gmra.mrb[6].mxu1 %vm58_vm0, %v341_v39 }
  0xf6   :  { %949 = vmatprep.mubr.msk.f32.mxu1 %vm58_vm0, %v342_v40 }
  0xf9   :  { %950 = vmatmul.mubr.msk.f32.gmra.mrb[8].mxu1 %vm58_vm0, %v343_v42 }
 0x1c0   :  { %v942_v52 = vpop.f32.mrb[2].mxu1 }
 0x1c1   :  { %v448_v54 = vpop.f32.mrb[3].mxu1  ;;  %v454_v57 = vadd.f32 %v942_v52, %v345_v53 }
 0x1c2   :  { %v449_v55 = vadd.f32 %v448_v54, %v344_v51 }
 0x1c3   :  { %v491_v3 = vsel %vm487_vm2, %v454_v57, -inf }
 0x1c4   :  { %v945_v58 = vpop.f32.mrb[4].mxu1  ;;  %v488_v59 = vsel %vm487_vm2, %v449_v55, -inf }
 0x1c5   :  { %v458_v61 = vpop.f32.mrb[5].mxu1  ;;  %489 = vmax.xlane.f32.xlu0 %v488_v59  ;;  %v464_v0 = vadd.f32 %v945_v58, %v347_v60 }
 0x1c6   :  { %v459_v62 = vadd.f32 %v458_v61, %v346_v56 }
 0x1c7   :  { %v497_v10 = vsel %vm487_vm2, %v464_v0, -inf }
 0x1c8   :  { %v948_v1 = vpop.f32.mrb[6].mxu1  ;;  %v494_v2 = vsel %vm487_vm2, %v459_v62, -inf }
 0x1c9   :  { %v468_v5 = vpop.f32.mrb[7].mxu1  ;;  %495 = vmax.xlane.f32.xlu1 %v494_v2  ;;  %492 = vmax.xlane.f32.xlu0 %v491_v3  ;;  %v474_v8 = vadd.f32 %v948_v1, %v349_v4  ;;  %v935_v3 = vpop.f32.mrb[2].mxu0  ;;  %v835_v4 = vld [vmem:[%s1375_s8] ss:$0 sm:$0xff] }
 0x1ca   :  { %v469_v6 = vadd.f32 %v468_v5, %v348_v63  ;;  %v319_v5 = vpop.f32.mrb[3].mxu0 }
 0x1cb   :  { %v503_v16 = vsel %vm487_vm2, %v474_v8, -inf }
 0x1cc   :  { %v951_v9 = vpop.f32.mrb[8].mxu1  ;;  %v500_v11 = vsel %vm487_vm2, %v469_v6, -inf }
 0x1cd   :  { %v478_v13 = vpop.f32.mrb[9].mxu1  ;;  %498 = vmax.xlane.f32.xlu1 %v497_v10  ;;  %501 = vmax.xlane.f32.xlu0 %v500_v11  ;;  %v484_v15 = vadd.f32 %v951_v9, %v351_v12 }
 0x1ce   :  { %v479_v14 = vadd.f32 %v478_v13, %v350_v7  ;;  %v320_v7 = vadd.f32 %v835_v4, %v319_v5 }
 0x1cf   :  { %v509_v18 = vsel %vm487_vm2, %v484_v15, -inf }
 0x1d0   :  { %v506_v17 = vsel %vm487_vm2, %v479_v14, -inf }
 0x1d1   :  { %504 = vmax.xlane.f32.xlu1 %v503_v16  ;;  %507 = vmax.xlane.f32.xlu0 %v506_v17 }
 0x1d5   :  { %510 = vmax.xlane.f32.xlu1 %v509_v18 }
 0x252   :  { %v490_v19 = vpop.xlane.xlu0 %489 }
 0x253   :  { %v512_v20 = vsub.f32 %v449_v55, %v490_v19 }
 0x255   :  { %v520_v21 = vmul.f32 1.442695, %v512_v20 }
 0x256   :  { %v496_v22 = vpop.xlane.xlu1 %495  ;;  %v493_v23 = vpop.xlane.xlu0 %492 }
 0x257   :  { %1024 = vpow2.f32 %v520_v21  ;;  %v514_v25 = vsub.f32 %v459_v62, %v496_v22  ;;  %v513_v26 = vsub.f32 %v454_v57, %v493_v23 }
 0x259   :  { %v524_v27 = vmul.f32 1.442695, %v514_v25  ;;  %v522_v28 = vmul.f32 1.442695, %v513_v26 }
 0x25a   :  { %v499_v31 = vpop.xlane.xlu1 %498  ;;  %v502_v32 = vpop.xlane.xlu0 %501 }
 0x25b   :  { %1026 = vpow2.f32 %v524_v27  ;;  %v515_v35 = vsub.f32 %v464_v0, %v499_v31  ;;  %v516_v36 = vsub.f32 %v469_v6, %v502_v32  ;;  %v325_v6 = vadd.f32 %v935_v3, %v835_v4 }
 0x25c   :  { %1028 = vpow2.f32 %v522_v28 }
 0x25d   :  { %v526_v39 = vmul.f32 1.442695, %v515_v35  ;;  %v528_v40 = vmul.f32 1.442695, %v516_v36 }
 0x25e   :  { %v505_v42 = vpop.xlane.xlu1 %504  ;;  %v508_v43 = vpop.xlane.xlu0 %507 }
 0x25f   :  { %1030 = vpow2.f32 %v526_v39  ;;  %v517_v44 = vsub.f32 %v474_v8, %v505_v42  ;;  %v518_v45 = vsub.f32 %v479_v14, %v508_v43  ;;  %v1009_v8 = vpack.c.bf16 %v325_v6, %v320_v7  ;;  %v720_v42 = vld [vmem:[%s1376_s9 + $0x8] sm:$0xff] }
 0x260   :  { %1032 = vpow2.f32 %v528_v40  ;;  %v719_v40 = vld [vmem:[%s1376_s9] sm:$0xff] }
 0x261   :  { %v1025_v46 = vpop.eup %1024  ;;  %v530_v47 = vmul.f32 1.442695, %v517_v44  ;;  %v532_v48 = vmul.f32 1.442695, %v518_v45  ;;  %1010 = vmatprep.subr.bf16.mxu0 %v1009_v8  ;;  %v1013_v43 = vpack.c.bf16 %v720_v42, %v719_v40  ;;  %v721_v44 = vld [vmem:[%s1376_s9 + $0x10] sm:$0xff]  ;;  %v722_v45 = vld [vmem:[%s1376_s9 + $0x18] sm:$0xff] }
 0x262   :  { %v511_v49 = vpop.xlane.xlu1 %510  ;;  %v536_v50 = vsel %vm487_vm2, %v1025_v46, 0.0  ;;  %1012 = vmatpush3.bf16.msra.mxu0 %v1009_v8 }
 0x263   :  { %1034 = vpow2.f32 %v530_v47  ;;  %v519_v51 = vsub.f32 %v484_v15, %v511_v49  ;;  %537 = vadd.xlane.f32.xlu0 %v536_v50  ;;  %1014 = vmatprep.subr.bf16.mxu1 %v1013_v43 }
 0x264   :  { %1036 = vpow2.f32 %v532_v48  ;;  %1016 = vmatpush3.bf16.msra.mxu1 %v1013_v43 }
 0x265   :  { %v1027_v52 = vpop.eup %1026  ;;  %v534_v53 = vmul.f32 1.442695, %v519_v51 }
 0x266   :  { %v1029_v54 = vpop.eup %1028  ;;  %v542_v55 = vsel %vm487_vm2, %v1027_v52, 0.0 }
 0x267   :  { %1038 = vpow2.f32 %v534_v53  ;;  %543 = vadd.xlane.f32.xlu0 %v542_v55  ;;  %v539_v56 = vsel %vm487_vm2, %v1029_v54, 0.0 }
 0x268   :  { %540 = vadd.xlane.f32.xlu1 %v539_v56 }
 0x269   :  { %v1031_v57 = vpop.eup %1030 }
 0x26a   :  { %v1033_v58 = vpop.eup %1032  ;;  %v545_v59 = vsel %vm487_vm2, %v1031_v57, 0.0 }
 0x26b   :  { %v548_v60 = vsel %vm487_vm2, %v1033_v58, 0.0 }
 0x26c   :  { %546 = vadd.xlane.f32.xlu1 %v545_v59  ;;  %549 = vadd.xlane.f32.xlu0 %v548_v60 }
 0x26d   :  { %v1035_v61 = vpop.eup %1034 }
 0x26e   :  { %v1037_v62 = vpop.eup %1036  ;;  %v551_v63 = vsel %vm487_vm2, %v1035_v61, 0.0 }
 0x26f   :  { %v554_v0 = vsel %vm487_vm2, %v1037_v62, 0.0 }
 0x270   :  { %552 = vadd.xlane.f32.xlu1 %v551_v63  ;;  %555 = vadd.xlane.f32.xlu0 %v554_v0 }
 0x271   :  { %v1039_v1 = vpop.eup %1038 }
 0x272   :  { %v557_v2 = vsel %vm487_vm2, %v1039_v1, 0.0 }
 0x274   :  { %558 = vadd.xlane.f32.xlu1 %v557_v2 }
 0x2f0   :  { %v538_v9 = vpop.xlane.xlu0 %537 }
 0x2f1   :  { %1040 = vrcp.f32 %v538_v9 }
 0x2f4   :  { %v544_v10 = vpop.xlane.xlu0 %543 }
 0x2f5   :  { %v541_v11 = vpop.xlane.xlu1 %540  ;;  %1042 = vrcp.f32 %v544_v10 }
 0x2f6   :  { %1044 = vrcp.f32 %v541_v11 }
 0x2f9   :  { %v547_v12 = vpop.xlane.xlu1 %546  ;;  %v550_v13 = vpop.xlane.xlu0 %549 }
 0x2fa   :  { %1046 = vrcp.f32 %v547_v12 }
 0x2fb   :  { %v1041_v14 = vpop.eup %1040  ;;  %1048 = vrcp.f32 %v550_v13 }
 0x2fc   :  { %v568_v15 = vmul.f32 %v1041_v14, %v1025_v46  ;;  %v1017_v46 = vpack.c.bf16 %v722_v45, %v721_v44 }
 0x2fd   :  { %v553_v16 = vpop.xlane.xlu1 %552  ;;  %v556_v17 = vpop.xlane.xlu0 %555 }
 0x2fe   :  { %1050 = vrcp.f32 %v553_v16  ;;  %956 = vmatprep.mubr.msk.f32.mxu0 %vm487_vm2, %v568_v15  ;;  %1018 = vmatprep.subr.bf16.mxu1 %v1017_v46 }
 0x2ff   :  { %v1043_v18 = vpop.eup %1042  ;;  %1052 = vrcp.f32 %v556_v17  ;;  %1020 = vmatpush3.bf16.msra.mxu1 %v1017_v46 }
 0x300   :  { %v1045_v19 = vpop.eup %1044  ;;  %v570_v20 = vmul.f32 %v1043_v18, %v1027_v52 }
 0x301   :  { %v569_v21 = vmul.f32 %v1045_v19, %v1029_v54  ;;  %v559_v22 = vpop.xlane.xlu1 %558 }
 0x302   :  { %1054 = vrcp.f32 %v559_v22 }
 0x303   :  { %957 = vmatmul.mubr.msk.f32.vlgmr.msra.gmra.mrb[4].mxu0 %vm487_vm2, %v569_v21 }
 0x304   :  { %v1047_v23 = vpop.eup %1046  ;;  %959 = vmatprep.mubr.msk.f32.mxu0 %vm487_vm2, %v570_v20 }
 0x305   :  { %v1049_v25 = vpop.eup %1048  ;;  %v571_v26 = vmul.f32 %v1047_v23, %v1031_v57 }
 0x306   :  { %v572_v27 = vmul.f32 %v1049_v25, %v1033_v58 }
 0x307   :  { %960 = vmatmul.mubr.msk.f32.gmra.mrb[6].mxu0 %vm487_vm2, %v571_v26 }
 0x308   :  { %v1051_v28 = vpop.eup %1050  ;;  %962 = vmatprep.mubr.msk.f32.mxu0 %vm487_vm2, %v572_v27 }
 0x309   :  { %v1053_v31 = vpop.eup %1052  ;;  %v573_v32 = vmul.f32 %v1051_v28, %v1035_v61 }
 0x30a   :  { %v574_v35 = vmul.f32 %v1053_v31, %v1037_v62 }
 0x30b   :  { %963 = vmatmul.mubr.msk.f32.gmra.mrb[8].mxu0 %vm487_vm2, %v573_v32 }
 0x30c   :  { %v1055_v36 = vpop.eup %1054  ;;  %965 = vmatprep.mubr.msk.f32.mxu0 %vm487_vm2, %v574_v35 }
 0x30d   :  { %v575_v39 = vmul.f32 %v1055_v36, %v1039_v1 }
 0x30f   :  { %966 = vmatmul.mubr.msk.f32.gmra.mrb[10].mxu0 %vm487_vm2, %v575_v39 }
 0x3d6   :  { %v958_v47 = vpop.f32.mrb[4].mxu0 }
 0x3d7   :  { %v666_v48 = vpop.f32.mrb[5].mxu0  ;;  %v706_v50 = vmul.f32 %v958_v47, %v1211_v29 }
 0x3d8   :  { %v705_v53 = vmul.f32 %v666_v48, %v1202_v24 }
 0x3da   :  { %v961_v49 = vpop.f32.mrb[6].mxu0 }
 0x3db   :  { %v708_v51 = vmul.f32 %v961_v49, %v1223_v33  ;;  %v676_v52 = vpop.f32.mrb[7].mxu0 }
 0x3dc   :  { %v707_v54 = vmul.f32 %v676_v52, %v1216_v30  ;;  %v856_v30 = vld [vmem:[%s1377_s10] ss:$0 sm:$0xff] }
 0x3dd   :  { %v714_v55 = vadd.f32 %v708_v51, %v706_v50 }
 0x3de   :  { %v713_v56 = vadd.f32 %v707_v54, %v705_v53  ;;  %v964_v57 = vpop.f32.mrb[8].mxu0 }
 0x3df   :  { %v710_v58 = vmul.f32 %v964_v57, %v1237_v37  ;;  %v686_v59 = vpop.f32.mrb[9].mxu0 }
 0x3e0   :  { %v709_v60 = vmul.f32 %v686_v59, %v1229_v34 }
 0x3e1   :  { %v716_v61 = vadd.f32 %v714_v55, %v710_v58 }
 0x3e2   :  { %v715_v62 = vadd.f32 %v713_v56, %v709_v60  ;;  %v967_v63 = vpop.f32.mrb[10].mxu0 }
 0x3e3   :  { %v712_v29 = vmul.f32 %v967_v63, %v1251_v41  ;;  %v696_v0 = vpop.f32.mrb[11].mxu0 }
 0x3e4   :  { %v711_v33 = vmul.f32 %v696_v0, %v1243_v38 }
 0x3e5   :  { %v718_v1 = vadd.f32 %v716_v61, %v712_v29 }
 0x3e6   :  { %v717_v24 = vadd.f32 %v715_v62, %v711_v33 }
 0x3e8   :  { %976 = vmatprep.mubr.msk.f32.mxu1 %vm58_vm0, %v717_v24 }
 0x3e9   :  { %977 = vmatmul.mubr.msk.f32.vlgmr.msra.gmra.mrb[10].mxu1 %vm58_vm0, %v718_v1 }
 0x4bc   :  { %v978_v34 = vpop.f32.mrb[10].mxu1 }
 0x4bd   :  { %v808_v37 = vadd.f32 %v978_v34, %v856_v30  ;;  %v802_v2 = vpop.f32.mrb[11].mxu1 }
 0x4be   :  { %v803_v3 = vadd.f32 %v856_v30, %v802_v2 }
 0x4bf   :  { %812 = vst.msk [vmem:[#allocation2 + $0x8] sm:$0xff] %vm58_vm0, %v808_v37 }
 0x4c0   :  { %811 = vst.msk [vmem:[#allocation2] sm:$0xff] %vm58_vm0, %v803_v3 }
 0x4c1   :  { %1067 = shalt.err (!%p1064_p4)
}
 0x4c2   :  { %s1068_s19 = scalar_lea.hbm %s1380_s13, 256 }
 0x4c3   :  { %p1069_p5 = scmp.ne.s32.totalorder %s1380_s13, %s1068_s19  ;;  %p1072_p6 = scmp.lt.u32.totalorder %s1068_s19, %s1380_s13 }
 0x4c5   :  { %p1074_p7 = pnand %p1072_p6, %p1069_p5 }
 0x4c7   :  { %1077 = shalt.err (!%p1074_p7)
}
 0x4c8   :  { %s1081_s23 = smov 128   ;;  %s1082_s5 = smov 8  }
 0x4c9   :  { %824 = dma.vmem_to_hbm [thread:$0]  %s819_s17, 256, %s1380_s13, [#allocation3], %s1081_s23, %s1081_s23, %s1082_s5  }
 0x4ca   :  { %1078 = dma.done.wait [#allocation3], 256  }
 0x4cb   :  { %1079 = vsyncadd [#allocation3], 4294967040 }
 0x4cc   :  { %828 = vsyncpa [#allocation3], 1 }

</bundles_post_ra>
